<compile_context>
chip_gen: v6e
topology: v6e:2x2x1
jax: 0.10.0
libtpu: 0.0.40
codegen_flags: <defaults>
</compile_context>

<pallas_src>
import jax
import jax.numpy as jnp
from jax.experimental import pallas as pl
from jax.experimental.pallas import tpu as pltpu

NEG_SLOPE = 0.01  # nn.LeakyReLU default
BN_EPS = 1e-5     # nn.BatchNorm3d default

# VMEM budget for the pipelined tiles (input + output double-buffered + f32
# intermediates).  12 MiB fits comfortably inside every generation's default
# scoped VMEM (v5e 16 MiB, v6e/v7x 32 MiB), so no vmem_limit_bytes override is
# needed.
VMEM_BUDGET_BYTES = 12 * 1024 * 1024


def _leaky(x):
    return jnp.where(x > 0, x, NEG_SLOPE * x)


def feedforward_kernel(x_ref, w1_ref, b1_ref, w2_ref, b2_ref, o_ref):
    # x_ref: (1, C_in, ts) channels-first tile; lane axis = spatial tile.
    x = x_ref[0]                       # (C_in, ts) f32
    w1 = w1_ref[...]                   # (C_out, C_in)   BN scale pre-folded
    w2 = w2_ref[...]                   # (C_out, C_out)  BN scale pre-folded
    c_out, c_in = w1.shape

    # convBlock 1: pointwise conv as unrolled VPU broadcast-FMAs (K is tiny, so
    # the MXU push/pop cadence would dominate; VALU slots have plenty of slack).
    h = w1[:, 0:1] * x[0:1, :]                        # (C_out, ts)
    for c in range(1, c_in):
        h = h + w1[:, c : c + 1] * x[c : c + 1, :]
    h = _leaky(h + b1_ref[...])

    # convBlock 2
    y = w2[:, 0:1] * h[0:1, :]                        # (C_out, ts)
    for c in range(1, c_out):
        y = y + w2[:, c : c + 1] * h[c : c + 1, :]
    y = _leaky(y + b2_ref[...])

    o_ref[0] = y.astype(o_ref.dtype)


def _bytes_per_lane(c_in, c_out, itemsize):
    """Approximate VMEM bytes needed per spatial lane of tile."""
    pad8 = lambda c: ((c + 7) // 8) * 8          # sublane padding
    x_b = pad8(c_in) * itemsize * 2              # input tile, double-buffered
    o_b = pad8(c_out) * itemsize * 2             # output tile, double-buffered
    tmp = pad8(c_out) * 4 * 2                    # f32 h / y intermediates
    return x_b + o_b + tmp


def _pick_tile(S, cap):
    """Pick a spatial tile: full S if it fits, else prefer a 512-multiple that
    divides S (no ragged tail), else the largest 512-multiple under the cap."""
    if S <= cap:
        return S
    t = (cap // 512) * 512
    best = None
    probe = t
    while probe >= 512:
        if S % probe == 0:
            best = probe
            break
        probe -= 512
    return best if best is not None else max(t, 512)


def feedforward_pallas(x_ncdhw, params):
    """x_ncdhw: (N, C_in, D, H, W) float32.  Returns (N, C_out, D, H, W)."""
    w1, b1, w2, b2 = params
    N, C_in, D, H, W = x_ncdhw.shape
    C_out = w1.shape[0]
    S = D * H * W

    # Channels-first: pure reshape (no data movement), spatial axis last (lanes).
    x3 = x_ncdhw.reshape(N, C_in, S)

    # Spatial tile sized from the VMEM budget (multiple of 512 lanes).
    bpl = _bytes_per_lane(C_in, C_out, x3.dtype.itemsize)
    cap = max(512, (VMEM_BUDGET_BYTES // bpl) // 512 * 512)
    ts = _pick_tile(S, cap)

    # Keep at least 2 grid points when possible so both v7x TensorCores get work.
    n_s = pl.cdiv(S, ts)
    if N * n_s < 2 and S >= 256:
        ts = max(128, ((S + 1) // 2 + 127) // 128 * 128)
        n_s = pl.cdiv(S, ts)

    grid = (N, n_s)  # ragged tail (if any) handled by Pallas block masking

    out3 = pl.pallas_call(
        feedforward_kernel,
        out_shape=jax.ShapeDtypeStruct((N, C_out, S), x3.dtype),
        grid_spec=pltpu.PrefetchScalarGridSpec(
            num_scalar_prefetch=0,
            grid=grid,
            in_specs=[
                pl.BlockSpec((1, C_in, ts), lambda n, s: (n, 0, s)),   # X tile
                pl.BlockSpec((C_out, C_in), lambda n, s: (0, 0)),      # W1 (scale-folded)
                pl.BlockSpec((C_out, 1), lambda n, s: (0, 0)),         # bias1
                pl.BlockSpec((C_out, C_out), lambda n, s: (0, 0)),     # W2 (scale-folded)
                pl.BlockSpec((C_out, 1), lambda n, s: (0, 0)),         # bias2
            ],
            out_specs=pl.BlockSpec((1, C_out, ts), lambda n, s: (n, 0, s)),
        ),
        compiler_params=pltpu.CompilerParams(
            # Both grid axes are independent -> shardable across TensorCores (v7x).
            dimension_semantics=("parallel", "parallel"),
        ),
    )(x3, w1, b1, w2, b2)

    return out3.reshape(N, C_out, D, H, W)


def make_params(key, c_in, c_out):
    """Deterministic synthetic parameters matching the PyTorch module's shapes.

    Conv3d weights are (C_out, C_in, 1, 1, 1) -> stored as (C_out, C_in).
    BatchNorm3d (eval) is folded:
        scale = gamma / sqrt(running_var + eps)   -> folded into the conv weight
        bias  = beta - running_mean * scale       -> passed as (C_out, 1)
    """
    ks = jax.random.split(key, 10)

    def bn_fold(kg, kb, km, kv, c):
        gamma = jax.random.uniform(kg, (c,), jnp.float32, 0.5, 1.5)
        beta = jax.random.normal(kb, (c,), jnp.float32) * 0.1
        rmean = jax.random.normal(km, (c,), jnp.float32) * 0.1
        rvar = jax.random.uniform(kv, (c,), jnp.float32, 0.5, 1.5)
        scale = gamma / jnp.sqrt(rvar + BN_EPS)
        bias = beta - rmean * scale
        return scale, bias

    w1 = jax.random.normal(ks[0], (c_out, c_in), jnp.float32) / jnp.sqrt(jnp.float32(c_in))
    s1, b1 = bn_fold(ks[1], ks[2], ks[3], ks[4], c_out)

    w2 = jax.random.normal(ks[5], (c_out, c_out), jnp.float32) / jnp.sqrt(jnp.float32(c_out))
    s2, b2 = bn_fold(ks[6], ks[7], ks[8], ks[9], c_out)

    # Fold BN scale into the conv weights (inference-mode BN).
    w1f = w1 * s1[:, None]           # (C_out, C_in)
    w2f = w2 * s2[:, None]           # (C_out, C_out)
    return w1f, b1[:, None], w2f, b2[:, None]


def feedforward_ref(x_ncdhw, params):
    """Pure-JAX reference with identical semantics (for a sanity check)."""
    w1, b1, w2, b2 = params
    N, C_in, D, H, W = x_ncdhw.shape
    C_out = w1.shape[0]
    x3 = x_ncdhw.reshape(N, C_in, -1)
    h = _leaky(jnp.einsum("oc,ncs->nos", w1, x3) + b1[None])
    y = _leaky(jnp.einsum("oc,ncs->nos", w2, h) + b2[None])
    return y.reshape(N, C_out, D, H, W)


if __name__ == "__main__":
    key = jax.random.PRNGKey(0)
    k_x, k_p = jax.random.split(key)

    # Feedforward(inplace=4, outplace=8) on a small 3-D volume.
    N, C_in, C_out, D, H, W = 2, 4, 8, 4, 8, 8
    x = jax.random.normal(k_x, (N, C_in, D, H, W), jnp.float32)
    params = make_params(k_p, C_in, C_out)

    out = feedforward_pallas(x, params)
    out = jax.block_until_ready(out)

    ref = feedforward_ref(x, params)
    assert out.shape == (N, C_out, D, H, W)
    assert jnp.allclose(out, ref, atol=1e-4, rtol=1e-4)

    print("KERNEL_OK")
</pallas_src>

<mosaic_0001>
module attributes {stable_mosaic.version = 11 : i64} {
  func.func @feedforward_kernel(%arg0: i32, %arg1: i32, %arg2: memref<1x4x256xf32, #tpu.memory_space<vmem>>, %arg3: memref<8x4xf32, #tpu.memory_space<vmem>>, %arg4: memref<8x1xf32, #tpu.memory_space<vmem>>, %arg5: memref<8x8xf32, #tpu.memory_space<vmem>>, %arg6: memref<8x1xf32, #tpu.memory_space<vmem>>, %arg7: memref<1x8x256xf32, #tpu.memory_space<vmem>>) attributes {dimension_semantics = [#tpu.dimension_semantics<parallel>, #tpu.dimension_semantics<parallel>], iteration_bounds = array<i64: 2, 1>, scalar_prefetch = 0 : i64, scratch_operands = 0 : i64, tpu.core_type = #tpu.core_type<tc>, window_params = [{transform_indices = @transform_0, window_bounds = array<i64: 1, 4, 256>}, {pipeline_mode = #tpu.pipeline_mode<synchronous>, transform_indices = @transform_1, window_bounds = array<i64: 8, 4>}, {pipeline_mode = #tpu.pipeline_mode<synchronous>, transform_indices = @transform_2, window_bounds = array<i64: 8, 1>}, {pipeline_mode = #tpu.pipeline_mode<synchronous>, transform_indices = @transform_3, window_bounds = array<i64: 8, 8>}, {pipeline_mode = #tpu.pipeline_mode<synchronous>, transform_indices = @transform_4, window_bounds = array<i64: 8, 1>}, {transform_indices = @transform_5, window_bounds = array<i64: 1, 8, 256>}]} {
    %c0 = arith.constant 0 : index
    %c0_0 = arith.constant 0 : index
    %c0_1 = arith.constant 0 : index
    %0 = vector.load %arg2[%c0, %c0_0, %c0_1] : memref<1x4x256xf32, #tpu.memory_space<vmem>>, vector<1x4x256xf32>
    %1 = vector.shape_cast %0 : vector<1x4x256xf32> to vector<4x256xf32>
    %c0_2 = arith.constant 0 : index
    %c0_3 = arith.constant 0 : index
    %2 = vector.load %arg3[%c0_2, %c0_3] : memref<8x4xf32, #tpu.memory_space<vmem>>, vector<8x4xf32>
    %c0_4 = arith.constant 0 : index
    %c0_5 = arith.constant 0 : index
    %3 = vector.load %arg5[%c0_4, %c0_5] : memref<8x8xf32, #tpu.memory_space<vmem>>, vector<8x8xf32>
    %4 = vector.extract_strided_slice %2 {offsets = [0, 0], sizes = [8, 1], strides = [1, 1]} : vector<8x4xf32> to vector<8x1xf32>
    %5 = vector.extract_strided_slice %1 {offsets = [0, 0], sizes = [1, 256], strides = [1, 1]} : vector<4x256xf32> to vector<1x256xf32>
    %6 = vector.broadcast %4 : vector<8x1xf32> to vector<8x256xf32>
    %7 = vector.broadcast %5 : vector<1x256xf32> to vector<8x256xf32>
    %8 = arith.mulf %6, %7 : vector<8x256xf32>
    %9 = vector.extract_strided_slice %2 {offsets = [0, 1], sizes = [8, 1], strides = [1, 1]} : vector<8x4xf32> to vector<8x1xf32>
    %10 = vector.extract_strided_slice %1 {offsets = [1, 0], sizes = [1, 256], strides = [1, 1]} : vector<4x256xf32> to vector<1x256xf32>
    %11 = vector.broadcast %9 : vector<8x1xf32> to vector<8x256xf32>
    %12 = vector.broadcast %10 : vector<1x256xf32> to vector<8x256xf32>
    %13 = arith.mulf %11, %12 : vector<8x256xf32>
    %14 = arith.addf %8, %13 : vector<8x256xf32>
    %15 = vector.extract_strided_slice %2 {offsets = [0, 2], sizes = [8, 1], strides = [1, 1]} : vector<8x4xf32> to vector<8x1xf32>
    %16 = vector.extract_strided_slice %1 {offsets = [2, 0], sizes = [1, 256], strides = [1, 1]} : vector<4x256xf32> to vector<1x256xf32>
    %17 = vector.broadcast %15 : vector<8x1xf32> to vector<8x256xf32>
    %18 = vector.broadcast %16 : vector<1x256xf32> to vector<8x256xf32>
    %19 = arith.mulf %17, %18 : vector<8x256xf32>
    %20 = arith.addf %14, %19 : vector<8x256xf32>
    %21 = vector.extract_strided_slice %2 {offsets = [0, 3], sizes = [8, 1], strides = [1, 1]} : vector<8x4xf32> to vector<8x1xf32>
    %22 = vector.extract_strided_slice %1 {offsets = [3, 0], sizes = [1, 256], strides = [1, 1]} : vector<4x256xf32> to vector<1x256xf32>
    %23 = vector.broadcast %21 : vector<8x1xf32> to vector<8x256xf32>
    %24 = vector.broadcast %22 : vector<1x256xf32> to vector<8x256xf32>
    %25 = arith.mulf %23, %24 : vector<8x256xf32>
    %26 = arith.addf %20, %25 : vector<8x256xf32>
    %c0_6 = arith.constant 0 : index
    %c0_7 = arith.constant 0 : index
    %27 = vector.load %arg4[%c0_6, %c0_7] : memref<8x1xf32, #tpu.memory_space<vmem>>, vector<8x1xf32>
    %28 = vector.broadcast %27 : vector<8x1xf32> to vector<8x256xf32>
    %29 = arith.addf %26, %28 : vector<8x256xf32>
    %cst = arith.constant 0.000000e+00 : f32
    %30 = vector.broadcast %cst : f32 to vector<8x256xf32>
    %31 = arith.cmpf ogt, %29, %30 : vector<8x256xf32>
    %cst_8 = arith.constant 0.00999999977 : f32
    %32 = vector.broadcast %cst_8 : f32 to vector<8x256xf32>
    %33 = arith.mulf %32, %29 : vector<8x256xf32>
    %34 = arith.select %31, %29, %33 : vector<8x256xi1>, vector<8x256xf32>
    %35 = vector.extract_strided_slice %3 {offsets = [0, 0], sizes = [8, 1], strides = [1, 1]} : vector<8x8xf32> to vector<8x1xf32>
    %36 = vector.extract_strided_slice %34 {offsets = [0, 0], sizes = [1, 256], strides = [1, 1]} : vector<8x256xf32> to vector<1x256xf32>
    %37 = vector.broadcast %35 : vector<8x1xf32> to vector<8x256xf32>
    %38 = vector.broadcast %36 : vector<1x256xf32> to vector<8x256xf32>
    %39 = arith.mulf %37, %38 : vector<8x256xf32>
    %40 = vector.extract_strided_slice %3 {offsets = [0, 1], sizes = [8, 1], strides = [1, 1]} : vector<8x8xf32> to vector<8x1xf32>
    %41 = vector.extract_strided_slice %34 {offsets = [1, 0], sizes = [1, 256], strides = [1, 1]} : vector<8x256xf32> to vector<1x256xf32>
    %42 = vector.broadcast %40 : vector<8x1xf32> to vector<8x256xf32>
    %43 = vector.broadcast %41 : vector<1x256xf32> to vector<8x256xf32>
    %44 = arith.mulf %42, %43 : vector<8x256xf32>
    %45 = arith.addf %39, %44 : vector<8x256xf32>
    %46 = vector.extract_strided_slice %3 {offsets = [0, 2], sizes = [8, 1], strides = [1, 1]} : vector<8x8xf32> to vector<8x1xf32>
    %47 = vector.extract_strided_slice %34 {offsets = [2, 0], sizes = [1, 256], strides = [1, 1]} : vector<8x256xf32> to vector<1x256xf32>
    %48 = vector.broadcast %46 : vector<8x1xf32> to vector<8x256xf32>
    %49 = vector.broadcast %47 : vector<1x256xf32> to vector<8x256xf32>
    %50 = arith.mulf %48, %49 : vector<8x256xf32>
    %51 = arith.addf %45, %50 : vector<8x256xf32>
    %52 = vector.extract_strided_slice %3 {offsets = [0, 3], sizes = [8, 1], strides = [1, 1]} : vector<8x8xf32> to vector<8x1xf32>
    %53 = vector.extract_strided_slice %34 {offsets = [3, 0], sizes = [1, 256], strides = [1, 1]} : vector<8x256xf32> to vector<1x256xf32>
    %54 = vector.broadcast %52 : vector<8x1xf32> to vector<8x256xf32>
    %55 = vector.broadcast %53 : vector<1x256xf32> to vector<8x256xf32>
    %56 = arith.mulf %54, %55 : vector<8x256xf32>
    %57 = arith.addf %51, %56 : vector<8x256xf32>
    %58 = vector.extract_strided_slice %3 {offsets = [0, 4], sizes = [8, 1], strides = [1, 1]} : vector<8x8xf32> to vector<8x1xf32>
    %59 = vector.extract_strided_slice %34 {offsets = [4, 0], sizes = [1, 256], strides = [1, 1]} : vector<8x256xf32> to vector<1x256xf32>
    %60 = vector.broadcast %58 : vector<8x1xf32> to vector<8x256xf32>
    %61 = vector.broadcast %59 : vector<1x256xf32> to vector<8x256xf32>
    %62 = arith.mulf %60, %61 : vector<8x256xf32>
    %63 = arith.addf %57, %62 : vector<8x256xf32>
    %64 = vector.extract_strided_slice %3 {offsets = [0, 5], sizes = [8, 1], strides = [1, 1]} : vector<8x8xf32> to vector<8x1xf32>
    %65 = vector.extract_strided_slice %34 {offsets = [5, 0], sizes = [1, 256], strides = [1, 1]} : vector<8x256xf32> to vector<1x256xf32>
    %66 = vector.broadcast %64 : vector<8x1xf32> to vector<8x256xf32>
    %67 = vector.broadcast %65 : vector<1x256xf32> to vector<8x256xf32>
    %68 = arith.mulf %66, %67 : vector<8x256xf32>
    %69 = arith.addf %63, %68 : vector<8x256xf32>
    %70 = vector.extract_strided_slice %3 {offsets = [0, 6], sizes = [8, 1], strides = [1, 1]} : vector<8x8xf32> to vector<8x1xf32>
    %71 = vector.extract_strided_slice %34 {offsets = [6, 0], sizes = [1, 256], strides = [1, 1]} : vector<8x256xf32> to vector<1x256xf32>
    %72 = vector.broadcast %70 : vector<8x1xf32> to vector<8x256xf32>
    %73 = vector.broadcast %71 : vector<1x256xf32> to vector<8x256xf32>
    %74 = arith.mulf %72, %73 : vector<8x256xf32>
    %75 = arith.addf %69, %74 : vector<8x256xf32>
    %76 = vector.extract_strided_slice %3 {offsets = [0, 7], sizes = [8, 1], strides = [1, 1]} : vector<8x8xf32> to vector<8x1xf32>
    %77 = vector.extract_strided_slice %34 {offsets = [7, 0], sizes = [1, 256], strides = [1, 1]} : vector<8x256xf32> to vector<1x256xf32>
    %78 = vector.broadcast %76 : vector<8x1xf32> to vector<8x256xf32>
    %79 = vector.broadcast %77 : vector<1x256xf32> to vector<8x256xf32>
    %80 = arith.mulf %78, %79 : vector<8x256xf32>
    %81 = arith.addf %75, %80 : vector<8x256xf32>
    %c0_9 = arith.constant 0 : index
    %c0_10 = arith.constant 0 : index
    %82 = vector.load %arg6[%c0_9, %c0_10] : memref<8x1xf32, #tpu.memory_space<vmem>>, vector<8x1xf32>
    %83 = vector.broadcast %82 : vector<8x1xf32> to vector<8x256xf32>
    %84 = arith.addf %81, %83 : vector<8x256xf32>
    %cst_11 = arith.constant 0.000000e+00 : f32
    %85 = vector.broadcast %cst_11 : f32 to vector<8x256xf32>
    %86 = arith.cmpf ogt, %84, %85 : vector<8x256xf32>
    %cst_12 = arith.constant 0.00999999977 : f32
    %87 = vector.broadcast %cst_12 : f32 to vector<8x256xf32>
    %88 = arith.mulf %87, %84 : vector<8x256xf32>
    %89 = arith.select %86, %84, %88 : vector<8x256xi1>, vector<8x256xf32>
    %c0_13 = arith.constant 0 : index
    %c0_14 = arith.constant 0 : index
    %c0_15 = arith.constant 0 : index
    %90 = vector.load %arg7[%c0_13, %c0_14, %c0_15] : memref<1x8x256xf32, #tpu.memory_space<vmem>>, vector<1x8x256xf32>
    %91 = vector.shape_cast %90 : vector<1x8x256xf32> to vector<8x256xf32>
    %92 = vector.shape_cast %89 : vector<8x256xf32> to vector<1x8x256xf32>
    tpu.vector_store %arg7[%c0_13, %c0_14, %c0_15], %92 {strides = array<i32>} : memref<1x8x256xf32, #tpu.memory_space<vmem>>, vector<1x8x256xf32>,
    return
  }
  func.func @transform_0(%arg0: i32, %arg1: i32) -> (i32, i32, i32) {
    %c0_i32 = arith.constant 0 : i32
    %c0_i32_0 = arith.constant 0 : i32
    return %arg0, %c0_i32, %arg1 : i32, i32, i32
  }
  func.func @transform_1(%arg0: i32, %arg1: i32) -> (i32, i32) {
    %c0_i32 = arith.constant 0 : i32
    %c0_i32_0 = arith.constant 0 : i32
    %c0_i32_1 = arith.constant 0 : i32
    return %c0_i32, %c0_i32_0 : i32, i32
  }
  func.func @transform_2(%arg0: i32, %arg1: i32) -> (i32, i32) {
    %c0_i32 = arith.constant 0 : i32
    %c0_i32_0 = arith.constant 0 : i32
    %c0_i32_1 = arith.constant 0 : i32
    return %c0_i32, %c0_i32_0 : i32, i32
  }
  func.func @transform_3(%arg0: i32, %arg1: i32) -> (i32, i32) {
    %c0_i32 = arith.constant 0 : i32
    %c0_i32_0 = arith.constant 0 : i32
    %c0_i32_1 = arith.constant 0 : i32
    return %c0_i32, %c0_i32_0 : i32, i32
  }
  func.func @transform_4(%arg0: i32, %arg1: i32) -> (i32, i32) {
    %c0_i32 = arith.constant 0 : i32
    %c0_i32_0 = arith.constant 0 : i32
    %c0_i32_1 = arith.constant 0 : i32
    return %c0_i32, %c0_i32_0 : i32, i32
  }
  func.func @transform_5(%arg0: i32, %arg1: i32) -> (i32, i32, i32) {
    %c0_i32 = arith.constant 0 : i32
    %c0_i32_0 = arith.constant 0 : i32
    return %arg0, %c0_i32, %arg1 : i32, i32, i32
  }
}

</mosaic_0001>

<bundles_post_ra>
// kernel: tpu_custom_call.1
= control target key start
LH: loop header
LB: loop body
LE: loop exit
PB: predicated region body
PF: predicated region fallthrough
CT: control target
= control target key end

     0   :  { %10 = vsyncpa [#allocation3], 0  ;;  %s996_s0 = inlined_call_operand.vmem [shape: f32[2,4,256], index: 0, kind: input, shape index: {}]   ;;  %s997_s1 = inlined_call_operand.vmem [shape: f32[8,4], index: 1, kind: input, shape index: {}]   ;;  %s998_s2 = inlined_call_operand.vmem [shape: f32[8,1], index: 2, kind: input, shape index: {}]   ;;  %s999_s3 = inlined_call_operand.vmem [shape: f32[8,8], index: 3, kind: input, shape index: {}]   ;;  %s1000_s4 = inlined_call_operand.vmem [shape: f32[8,1], index: 4, kind: input, shape index: {}]   ;;  %s1001_s5 = inlined_call_operand.hbm [shape: f32[2,8,256], index: 5, kind: output, shape index: {}]  }
   0x1   :  { %12 = vsyncpa [#allocation3 + $0x1], 0  ;;  %s821_s18 = smov 0   ;;  %s823_s19 = smov 0  }
   0x2   :  { %s825_s20 = smov 0   ;;  %s827_s21 = smov 0  }
   0x3   :  { %s829_s22 = smov 0   ;;  %s831_s23 = smov 0  }
   0x4 LB: > { %s611_s24 = sadd.s32 4294967295, %s780_s23   ;;  %s612_s25 = sadd.s32 4294967294, %s780_s23   ;;  %s780_s23 = sphi %s831_s23, %s18_s23   ;;  %s776_s22 = sphi %s829_s22, %s1008_s22   ;;  %s772_s21 = sphi %s827_s21, %s1007_s21   ;;  %s768_s20 = sphi %s825_s20, %s1006_s20   ;;  %s764_s19 = sphi %s823_s19, %s1005_s19   ;;  %s760_s18 = sphi %s821_s18, %s1004_s18  }
   0x5   : > { %s30_s26 = sadd.s32 1, %s776_s22  ;;  %s151_s27 = sadd.s32 1, %s768_s20 }
   0x6   : > { %p32_p0 = scmp.ge.s32.totalorder %s30_s26, 2  ;;  %p161_p1 = scmp.ne.s32.totalorder %s768_s20, %s764_s19 }
   0x7   : > { %p162_p2 = scmp.eq.s32.totalorder %s611_s24, 1  ;;  %p167_p3 = scmp.ne.s32.totalorder %s764_s19, %s760_s18 }
   0x8   : > { %s1010_s26 = smov (%p32_p0, %s30_s26), 0  ;;  %p168_p5 = scmp.eq.s32.totalorder %s612_s25, 1 }
   0x9   : > { %p861_p4 = por %p162_p2, %p161_p1  ;;  %s146_s29 = ssub.s32 %s776_s22, %s1010_s26 }
   0xa   : > { %p615_p6 = scmp.ge.s32.totalorder %s780_s23, 1  ;;  %p149_p7 = scmp.eq.s32.totalorder %s146_s29, 0 }
   0xb   : > { %p868_p8 = por %p168_p5, %p167_p3  ;;  %p211_p9 = scmp.lt.s32.totalorder %s780_s23, 3 }
   0xc   : > { %s874_s6 = scalar_select %p149_p7, %s768_s20, %s151_s27  }
   0xd   : > { %p212_p10 = pnand %p615_p6, %p211_p9 }
   0xe   : > { %p244_p11 = scmp.lt.s32.totalorder (!%p212_p10), %s772_s21, 1  ;;  %s240_s27 = sand.u32 (!%p212_p10), 1, %s764_s19  }
   0xf   : > { %215 = sbr.rel (%p212_p10) target bundleno = 204 (0xcc), region = 40  ;;  %s616_s29 = sshll.u32 (!%p212_p10), %s240_s27, 4 }
  0x10   : > { %s625_s7 = sshll.u32 (!%p212_p10), %s772_s21, 8  ;;  %s242_s8 = scalar_lea.vmem (!%p212_p10), [#allocation2], %s616_s29 }
  0x11   : > { %s535_s9 = sshll.u32 (!%p212_p10), %s242_s8, 4  ;;  %s948_s12 = scalar_lea.hbm (!%p212_p10), %s1001_s5, %s625_s7  ;;  %s950_s9 = int_to_ptr.vmem [resolvable:$true] %s535_s9 }
  0x12   : > { %s704_s13 = scalar_lea.vmem (!%p212_p10), %s950_s9, 256  ;;  %s790_s14 = smov (!%p212_p10), [#allocation2]  }
  0x13   : > { %p705_p12 = scmp.ne.s32.totalorder (!%p212_p10), %s950_s9, %s704_s13 }
  0x14   : > { %v255_v0 = vld [vmem:[%s997_s1] sm:$0xff]  ;;  %v782_v1 = vmov 2   ;;  %v783_v2 = vmov 0   ;;  %v784_v3 = vmov 3   ;;  %v785_v4 = vmov 1   ;;  %s245_s15 = scalar_select %p244_p11, %s772_s21, 1 }
  0x15   : > { %691 = vset.pattern.permute.xlu1 %v782_v1  ;;  %689 = vset.pattern.permute.xlu0 %v783_v2  ;;  %v361_v5 = vld [vmem:[%s998_s2] sm:$0xff]  ;;  %v786_v7 = vmov 6   ;;  %v787_v8 = vmov 4   ;;  %v788_v9 = vmov 5   ;;  %v789_v10 = vmov 7   ;;  %s519_s21 = scalar_lea.sflag [#allocation3], %s240_s27  ;;  %p706_p13 = pnand %p705_p12, %p861_p4 }
  0x16   : > { %310 = vperm.xlu1 %691, %v255_v0   ;;  %259 = vperm.xlu0 %689, %v255_v0   ;;  %v256_v6 = vld [vmem:[%s999_s3] sm:$0xff]  ;;  %v263_v12 = vlaneseq  ;;  %s624_s16 = sshll.u32 %s245_s15, 3  ;;  %s708_s15 = sshll.u32 %s790_s14, 4  ;;  %s709_s15 = int_to_ptr.vmem [resolvable:$false] %s708_s15 }
  0x17   : > { %v502_v11 = vld [vmem:[%s1000_s4] sm:$0xff]  ;;  %s251_s25 = scalar_lea.vmem %s996_s0, %s624_s16  ;;  %p707_p0 = pneg %p706_p13 }
  0x18   : > { %v264_v13 = vshrl.u32 %v263_v12, 7  ;;  %v254_v18 = vld [vmem:[%s251_s25] sm:$0xff]  ;;  %s710_s16 = scalar_lea.vmem %s709_s15, 512  ;;  %p711_p1 = scmp.lt.s32.totalorder %s950_s9, %s709_s15 }
  0x19   : > { %p712_p2 = scmp.lt.s32.totalorder %s710_s16, %s704_s13 }
  0x1a   : > { %692 = vset.pattern.permute.xlu1 %v784_v3  ;;  %690 = vset.pattern.permute.xlu0 %v785_v4  ;;  %v893_v14 = vsub.s32 0, %v264_v13  ;;  %v895_v15 = vsub.s32 4, %v264_v13  ;;  %v897_v16 = vsub.s32 1, %v264_v13  ;;  %v899_v17 = vsub.s32 5, %v264_v13 }
  0x1b   : > { %336 = vperm.xlu1 %692, %v255_v0   ;;  %284 = vperm.xlu0 %690, %v255_v0   ;;  %v901_v19 = vsub.s32 2, %v264_v13  ;;  %v903_v20 = vsub.s32 6, %v264_v13  ;;  %v907_v23 = vsub.s32 3, %v264_v13  ;;  %v909_v24 = vsub.s32 7, %v264_v13  ;;  %p713_p3 = por %p712_p2, %p711_p1 }
  0x1c   : > { %v266_v21 = vrot.slane %v254_v18, %v893_v14  ;;  %v270_v22 = vrot.slane %v254_v18, %v895_v15  ;;  %v290_v25 = vrot.slane %v254_v18, %v897_v16  ;;  %v294_v26 = vrot.slane %v254_v18, %v899_v17 }
  0x1d   : > { %v316_v28 = vrot.slane %v254_v18, %v901_v19  ;;  %v320_v29 = vrot.slane %v254_v18, %v903_v20  ;;  %v342_v33 = vrot.slane %v254_v18, %v907_v23  ;;  %v346_v34 = vrot.slane %v254_v18, %v909_v24  ;;  %p714_p5 = pnand %p713_p3, %p707_p0 }
  0x1e   : > { %v276_v31 = vrot.slane %v266_v21, %v893_v14  ;;  %v280_v32 = vrot.slane %v270_v22, %v893_v14  ;;  %v300_v35 = vrot.slane %v290_v25, %v897_v16  ;;  %v304_v36 = vrot.slane %v294_v26, %v897_v16 }
  0x1f   : > { %693 = vset.pattern.permute.xlu1 %v783_v2  ;;  %694 = vset.pattern.permute.xlu0 %v783_v2  ;;  %v326_v37 = vrot.slane %v316_v28, %v901_v19  ;;  %v330_v38 = vrot.slane %v320_v29, %v901_v19  ;;  %v352_v43 = vrot.slane %v342_v33, %v907_v23 }
  0x20   : > { %364 = vperm.xlu1 %693, %v361_v5   ;;  %377 = vperm.xlu0 %694, %v256_v6   ;;  %v356_v44 = vrot.slane %v346_v34, %v907_v23 }
  0x24   : > { %695 = vset.pattern.permute.xlu1 %v785_v4  ;;  %697 = vset.pattern.permute.xlu0 %v784_v3 }
  0x25   : > { %391 = vperm.xlu1 %695, %v256_v6   ;;  %423 = vperm.xlu0 %697, %v256_v6  }
  0x29   : > { %696 = vset.pattern.permute.xlu1 %v782_v1  ;;  %700 = vset.pattern.permute.xlu0 %v786_v7 }
  0x2a   : > { %407 = vperm.xlu1 %696, %v256_v6   ;;  %471 = vperm.xlu0 %700, %v256_v6  }
  0x2e   : > { %698 = vset.pattern.permute.xlu1 %v787_v8  ;;  %703 = vset.pattern.permute.xlu0 %v783_v2 }
  0x2f   : > { %439 = vperm.xlu1 %698, %v256_v6  }
  0x33   : > { %699 = vset.pattern.permute.xlu1 %v788_v9 }
  0x34   : > { %455 = vperm.xlu1 %699, %v256_v6  }
  0x38   : > { %701 = vset.pattern.permute.xlu1 %v789_v10 }
  0x39   : > { %487 = vperm.xlu1 %701, %v256_v6  }
  0x3d   : > { %702 = vset.pattern.permute.xlu1 %v783_v2 }
  0x3e   : > { %505 = vperm.xlu1 %702, %v502_v11  }
  0x91   : > { %v311_v27 = vpop.permute.xlu1 %310  ;;  %v260_v30 = vpop.permute.xlu0 %259 }
  0x92   : > { %v281_v39 = vmul.f32 %v276_v31, %v260_v30  ;;  %v282_v40 = vmul.f32 %v280_v32, %v260_v30  ;;  %v331_v47 = vmul.f32 %v326_v37, %v311_v27  ;;  %v332_v48 = vmul.f32 %v330_v38, %v311_v27 }
  0x96   : > { %v337_v41 = vpop.permute.xlu1 %336  ;;  %v285_v42 = vpop.permute.xlu0 %284 }
  0x97   : > { %v305_v45 = vmul.f32 %v300_v35, %v285_v42  ;;  %v306_v46 = vmul.f32 %v304_v36, %v285_v42  ;;  %v357_v51 = vmul.f32 %v352_v43, %v337_v41  ;;  %v358_v52 = vmul.f32 %v356_v44, %v337_v41 }
  0x99   : > { %v307_v49 = vadd.f32 %v305_v45, %v281_v39  ;;  %v308_v50 = vadd.f32 %v306_v46, %v282_v40 }
  0x9b   : > { %v365_v53 = vpop.permute.xlu1 %364  ;;  %v333_v54 = vadd.f32 %v331_v47, %v307_v49  ;;  %v334_v55 = vadd.f32 %v332_v48, %v308_v50  ;;  %v378_v63 = vpop.permute.xlu0 %377 }
  0x9d   : > { %v359_v56 = vadd.f32 %v357_v51, %v333_v54  ;;  %v360_v57 = vadd.f32 %v358_v52, %v334_v55 }
  0x9f   : > { %v367_v58 = vadd.f32 %v365_v53, %v359_v56  ;;  %v368_v59 = vadd.f32 %v365_v53, %v360_v57 }
  0xa0   : > { %v392_v60 = vpop.permute.xlu1 %391 }
  0xa1   : > { %vm369_vm0 = vcmp.gt.f32.partialorder %v367_v58, 0.0  ;;  %vm370_vm1 = vcmp.gt.f32.partialorder %v368_v59, 0.0  ;;  %v371_v61 = vmul.f32 0.01, %v367_v58  ;;  %v372_v62 = vmul.f32 0.01, %v368_v59 }
  0xa3   : > { %v373_v0 = vsel %vm369_vm0, %v367_v58, %v371_v61  ;;  %v374_v1 = vsel %vm370_vm1, %v368_v59, %v372_v62 }
  0xa4   : > { %v383_v2 = vrot.slane %v373_v0, %v893_v14  ;;  %v387_v3 = vrot.slane %v374_v1, %v893_v14  ;;  %v397_v4 = vrot.slane %v373_v0, %v897_v16  ;;  %v401_v5 = vrot.slane %v374_v1, %v897_v16  ;;  %v424_v14 = vpop.permute.xlu0 %423 }
  0xa5   : > { %v429_v6 = vrot.slane %v373_v0, %v907_v23  ;;  %v433_v7 = vrot.slane %v374_v1, %v907_v23  ;;  %v408_v8 = vpop.permute.xlu1 %407  ;;  %v413_v9 = vrot.slane %v373_v0, %v901_v19  ;;  %v417_v10 = vrot.slane %v374_v1, %v901_v19 }
  0xa6   : > { %v388_v11 = vmul.f32 %v383_v2, %v378_v63  ;;  %v389_v12 = vmul.f32 %v387_v3, %v378_v63  ;;  %v402_v13 = vmul.f32 %v397_v4, %v392_v60  ;;  %v403_v18 = vmul.f32 %v401_v5, %v392_v60 }
  0xa7   : > { %v418_v25 = vmul.f32 %v413_v9, %v408_v8  ;;  %v419_v26 = vmul.f32 %v417_v10, %v408_v8  ;;  %v434_v27 = vmul.f32 %v429_v6, %v424_v14  ;;  %v435_v16 = vmul.f32 %v433_v7, %v424_v14 }
  0xa8   : > { %v404_v21 = vadd.f32 %v402_v13, %v388_v11  ;;  %v405_v22 = vadd.f32 %v403_v18, %v389_v12  ;;  %v445_v23 = vrot.slane %v373_v0, %v895_v15  ;;  %v449_v31 = vrot.slane %v374_v1, %v895_v15  ;;  %v472_v39 = vpop.permute.xlu0 %471 }
  0xa9   : > { %v477_v35 = vrot.slane %v373_v0, %v903_v20  ;;  %v481_v36 = vrot.slane %v374_v1, %v903_v20  ;;  %v461_v37 = vrot.slane %v373_v0, %v899_v17  ;;  %v465_v38 = vrot.slane %v374_v1, %v899_v17 }
  0xaa   : > { %v420_v28 = vadd.f32 %v418_v25, %v404_v21  ;;  %v421_v29 = vadd.f32 %v419_v26, %v405_v22  ;;  %v440_v30 = vpop.permute.xlu1 %439  ;;  %v493_v48 = vrot.slane %v373_v0, %v909_v24  ;;  %v497_v20 = vrot.slane %v374_v1, %v909_v24 }
  0xab   : > { %v450_v33 = vmul.f32 %v445_v23, %v440_v30  ;;  %v451_v34 = vmul.f32 %v449_v31, %v440_v30  ;;  %v482_v15 = vmul.f32 %v477_v35, %v472_v39  ;;  %v483_v45 = vmul.f32 %v481_v36, %v472_v39 }
  0xac   : > { %v436_v19 = vadd.f32 %v434_v27, %v420_v28  ;;  %v437_v32 = vadd.f32 %v435_v16, %v421_v29 }
  0xae   : > { %v452_v41 = vadd.f32 %v450_v33, %v436_v19  ;;  %v453_v42 = vadd.f32 %v451_v34, %v437_v32 }
  0xaf   : > { %v456_v40 = vpop.permute.xlu1 %455 }
  0xb0   : > { %v466_v43 = vmul.f32 %v461_v37, %v456_v40  ;;  %v467_v44 = vmul.f32 %v465_v38, %v456_v40 }
  0xb2   : > { %v468_v46 = vadd.f32 %v466_v43, %v452_v41  ;;  %v469_v47 = vadd.f32 %v467_v44, %v453_v42 }
  0xb4   : > { %v488_v49 = vpop.permute.xlu1 %487  ;;  %v484_v50 = vadd.f32 %v482_v15, %v468_v46  ;;  %v485_v17 = vadd.f32 %v483_v45, %v469_v47 }
  0xb5   : > { %v498_v51 = vmul.f32 %v493_v48, %v488_v49  ;;  %v499_v52 = vmul.f32 %v497_v20, %v488_v49 }
  0xb7   : > { %v500_v53 = vadd.f32 %v498_v51, %v484_v50  ;;  %v501_v54 = vadd.f32 %v499_v52, %v485_v17 }
  0xb9   : > { %v506_v55 = vpop.permute.xlu1 %505 }
  0xba   : > { %v508_v56 = vadd.f32 %v506_v55, %v500_v53  ;;  %v509_v57 = vadd.f32 %v506_v55, %v501_v54 }
  0xbc   : > { %vm510_vm2 = vcmp.gt.f32.partialorder %v508_v56, 0.0  ;;  %vm511_vm3 = vcmp.gt.f32.partialorder %v509_v57, 0.0  ;;  %v512_v24 = vmul.f32 0.01, %v508_v56  ;;  %v513_v58 = vmul.f32 0.01, %v509_v57 }
  0xbe   : > { %v514_v59 = vsel %vm510_vm2, %v508_v56, %v512_v24  ;;  %v515_v60 = vsel %vm511_vm3, %v509_v57, %v513_v58 }
  0xbf   : > { %516 = vst [vmem:[%s242_s8] sm:$0xff] %v514_v59  ;;  %517 = vst [vmem:[%s242_s8 + $0x8] sm:$0xff] %v515_v60 }
  0xc0   : > { %717 = shalt.err (!%p714_p5)
}
  0xc1   : > { %s718_s17 = scalar_lea.hbm %s948_s12, 256  ;;  %s722_s27 = scalar_lea.hbm %s1001_s5, 512 }
  0xc2   : > { %p719_p6 = scmp.ne.s32.totalorder %s948_s12, %s718_s17  ;;  %p723_p10 = scmp.lt.s32.totalorder %s948_s12, %s1001_s5 }
  0xc3   : > { %p724_p11 = scmp.lt.s32.totalorder %s722_s27, %s718_s17 }
  0xc4   : > { %p720_p7 = pnand %p719_p6, %p861_p4 }
  0xc5   : > { %p725_p12 = por %p724_p11, %p723_p10 }
  0xc6   : > { %p721_p9 = pneg %p720_p7 }
  0xc8   : > { %p726_p13 = pnand %p725_p12, %p721_p9 }
  0xca   : > { %729 = shalt.err (!%p726_p13)
}
  0xcb   : > { %626 = dma.vmem_to_hbm [thread:$0]  (%p861_p4), %s950_s9, 256, %s948_s12, %s519_s21  }
  0xcc PF: > { %p632_p0 = scmp.ge.s32.totalorder %s780_s23, 2  ;;  %s547_s8 = sand.u32 1, %s760_s18  }
  0xcd   : > { %s548_s10 = scalar_lea.sflag [#allocation3], %s547_s8 }
  0xce   : > { %p629_p1 = pnand %p632_p0, %p868_p8 }
  0xd0   : > { %p630_p2 = pneg %p629_p1 }
  0xd2   : > { %755 = dma.done.wait (%p630_p2), %s548_s10, 256  }
  0xd3   : > { %757 = vsyncadd (%p630_p2), %s548_s10, 4294967040  ;;  %s18_s23 = sadd.s32 1, %s780_s23   ;;  %s1004_s18 = smov %s764_s19 }
  0xd4   : > { %p15_p3 = scmp.ge.s32.totalorder %s18_s23, 4   ;;  %s1005_s19 = smov %s768_s20 }
  0xd5   : > { %s1006_s20 = smov %s874_s6  ;;  %s1007_s21 = smov %s776_s22 }
  0xd6   : > { %s1008_s22 = smov %s1010_s26  ;;  %17 = sbr.rel (!%p15_p3) target bundleno = 4 (0x4), region = 75 }
  0xdb   :  { %553 = vsyncpa [#allocation3], 1 }
  0xdc   :  { %555 = vsyncpa [#allocation3 + $0x1], 1 }

</bundles_post_ra>
